<compile_context>
chip_gen: v7x
topology: tpu7x:2x2x1
jax: 0.10.0
libtpu: 0.0.40
codegen_flags: <defaults>
</compile_context>

<pallas_src>
import functools
import math

import jax
import jax.numpy as jnp
from jax.experimental import pallas as pl
from jax.experimental.pallas import tpu as pltpu


def _attention_kernel(q_ref, k_ref, v_ref, out_ref, attn_ref, *, scale):
    # Each grid step handles a block of batch_block batch elements.
    q = q_ref[...]   # (B_BLK, n_queries, query_dim)  -- native input dtype
    k = k_ref[...]   # (B_BLK, n_memory,  query_dim)
    v = v_ref[...]   # (B_BLK, n_memory,  value_dim)

    # scores[b, q, m] = sum_d q[b, q, d] * k[b, m, d]
    # (MXU, f32 accumulation, contraction on last dims -> no K transpose)
    scores = jnp.einsum("bqd,bkd->bqk", q, k, preferred_element_type=jnp.float32)

    if scale != 1.0:
        # Apply Transformer-style rescale on the f32 scores (exactly matches
        # the reference; also fewer elements than q whenever n_memory < q_dim).
        scores = scores * scale

    # Numerically stable softmax over n_memory, fully in f32.
    m = jnp.max(scores, axis=-1, keepdims=True)
    e = jnp.exp(scores - m)
    denom = jnp.sum(e, axis=-1, keepdims=True)
    weights = e * (1.0 / denom)          # exact reciprocal (no approx EUP table)

    # retrieved = weights @ values  (weights cast to v dtype for the MXU feed,
    # f32 accumulation)
    retrieved = jnp.einsum("bqk,bkv->bqv", weights.astype(v.dtype), v,
                           preferred_element_type=jnp.float32)

    attn_ref[...] = weights.astype(attn_ref.dtype)
    out_ref[...] = retrieved.astype(out_ref.dtype)


def _round_up(x, m):
    return ((x + m - 1) // m) * m


def _pick_batch_block(b, n_queries, n_memory, query_dim, value_dim, itemsize,
                      target_step_bytes=4 << 20, max_block=1024):
    """Pick a batch block targeting ~target_step_bytes of VMEM per grid step.

    Footprints are computed with (8,128) tile padding, with 2x for Pallas's
    input/output double buffering plus the f32 softmax intermediates.
    """
    def tile(rows, cols, isz):
        return _round_up(max(rows, 1), 8) * _round_up(max(cols, 1), 128) * isz

    per_batch_io = (tile(n_queries, query_dim, itemsize)     # q
                    + tile(n_memory, query_dim, itemsize)    # k
                    + tile(n_memory, value_dim, itemsize)    # v
                    + tile(n_queries, value_dim, itemsize)   # retrieved
                    + tile(n_queries, n_memory, itemsize))   # attention weights
    per_batch_f32 = (3 * tile(n_queries, n_memory, 4)        # scores / e / weights
                     + tile(n_queries, value_dim, 4))        # f32 retrieved acc
    per_batch = 2 * per_batch_io + per_batch_f32

    blk = max(1, min(max_block, b, target_step_bytes // max(per_batch, 1)))
    # Keep at least two grid steps whenever the batch allows it, so the
    # "parallel" batch axis can be sharded across both TensorCores on v7x.
    # One extra ~0.35us step is noise on single-TC chips (v5e/v6e).
    if blk >= b and b > 1:
        blk = (b + 1) // 2
    return int(blk)


def attention_forward(queries, keys, values, rescale=False, batch_block=None):
    """Pallas equivalent of Attention.forward (no masking)."""
    b, n_queries, query_dim = queries.shape
    kb, n_memory, kd = keys.shape
    vb, vm, value_dim = values.shape
    assert kb == b and vb == b and kd == query_dim and vm == n_memory

    if batch_block is None:
        batch_block = _pick_batch_block(
            b, n_queries, n_memory, query_dim, value_dim,
            jnp.dtype(queries.dtype).itemsize)
    batch_block = int(min(batch_block, b))
    # Non-divisible batch is fine: the partial last block's out-of-range rows
    # are simply never written back (rows are fully independent).
    grid_b = pl.cdiv(b, batch_block)

    scale = 1.0 / math.sqrt(float(query_dim)) if rescale else 1.0
    kernel = functools.partial(_attention_kernel, scale=scale)

    out_shape = (
        jax.ShapeDtypeStruct((b, n_queries, value_dim), queries.dtype),
        jax.ShapeDtypeStruct((b, n_queries, n_memory), queries.dtype),
    )

    grid_spec = pltpu.PrefetchScalarGridSpec(
        num_scalar_prefetch=0,
        grid=(grid_b,),
        in_specs=[
            pl.BlockSpec((batch_block, n_queries, query_dim), lambda i: (i, 0, 0)),
            pl.BlockSpec((batch_block, n_memory, query_dim), lambda i: (i, 0, 0)),
            pl.BlockSpec((batch_block, n_memory, value_dim), lambda i: (i, 0, 0)),
        ],
        out_specs=[
            pl.BlockSpec((batch_block, n_queries, value_dim), lambda i: (i, 0, 0)),
            pl.BlockSpec((batch_block, n_queries, n_memory), lambda i: (i, 0, 0)),
        ],
    )

    return pl.pallas_call(
        kernel,
        out_shape=out_shape,
        grid_spec=grid_spec,
        compiler_params=pltpu.CompilerParams(
            dimension_semantics=("parallel",),
            vmem_limit_bytes=32 * 1024 * 1024,
        ),
    )(queries, keys, values)


def _reference(queries, keys, values, rescale=False):
    # Pure broadcast-multiply/sum f32 reference: independent of XLA's default
    # (bf16-pass) TPU matmul precision, so the comparison is meaningful.
    scores = jnp.sum(queries[:, :, None, :] * keys[:, None, :, :], axis=-1)
    if rescale:
        scores = scores / jnp.sqrt(jnp.float32(queries.shape[-1]))
    w = jax.nn.softmax(scores, axis=-1)
    retrieved = jnp.sum(w[:, :, :, None] * values[:, None, :, :], axis=2)
    return retrieved, w


if __name__ == "__main__":
    # Small shapes consistent with the module's forward signature.
    batch, n_queries, n_memory, query_dim, value_dim = 6, 8, 16, 32, 32

    key = jax.random.PRNGKey(0)
    kq, kk, kv = jax.random.split(key, 3)
    queries = jax.random.normal(kq, (batch, n_queries, query_dim), dtype=jnp.float32)
    keys = jax.random.normal(kk, (batch, n_memory, query_dim), dtype=jnp.float32)
    values = jax.random.normal(kv, (batch, n_memory, value_dim), dtype=jnp.float32)

    # Tolerance sized for MXU pass-precision / accumulation-order differences.
    ATOL = RTOL = 5e-3

    # rescale=False (module default) and rescale=True (Transformer scaling).
    for rescale in (False, True):
        retrieved, attn = attention_forward(queries, keys, values, rescale=rescale)
        retrieved = jax.block_until_ready(retrieved)
        attn = jax.block_until_ready(attn)

        ref_retrieved, ref_attn = _reference(queries, keys, values, rescale=rescale)
        assert retrieved.shape == (batch, n_queries, value_dim)
        assert attn.shape == (batch, n_queries, n_memory)
        assert jnp.allclose(retrieved, ref_retrieved, atol=ATOL, rtol=RTOL), rescale
        assert jnp.allclose(attn, ref_attn, atol=ATOL, rtol=RTOL), rescale
        # attention weights sum to ~1 over n_memory
        assert jnp.allclose(jnp.sum(attn, axis=-1), 1.0, atol=1e-3), rescale

    # Non-divisible batch: cdiv grid with a masked partial last block.
    q5, k5, v5 = queries[:5], keys[:5], values[:5]
    retrieved5, attn5 = attention_forward(q5, k5, v5, rescale=False, batch_block=2)
    retrieved5 = jax.block_until_ready(retrieved5)
    attn5 = jax.block_until_ready(attn5)
    ref_retrieved5, ref_attn5 = _reference(q5, k5, v5, rescale=False)
    assert jnp.allclose(retrieved5, ref_retrieved5, atol=ATOL, rtol=RTOL)
    assert jnp.allclose(attn5, ref_attn5, atol=ATOL, rtol=RTOL)

    print("KERNEL_OK")
</pallas_src>

<mosaic_0001>
module attributes {stable_mosaic.version = 11 : i64} {
  func.func @_attention_kernel(%arg0: i32, %arg1: memref<3x8x32xf32, #tpu.memory_space<vmem>>, %arg2: memref<3x16x32xf32, #tpu.memory_space<vmem>>, %arg3: memref<3x16x32xf32, #tpu.memory_space<vmem>>, %arg4: memref<3x8x32xf32, #tpu.memory_space<vmem>>, %arg5: memref<3x8x16xf32, #tpu.memory_space<vmem>>) attributes {dimension_semantics = [#tpu.dimension_semantics<parallel>], iteration_bounds = array<i64: 2>, scalar_prefetch = 0 : i64, scratch_operands = 0 : i64, tpu.core_type = #tpu.core_type<tc>, window_params = [{transform_indices = @transform_0, window_bounds = array<i64: 3, 8, 32>}, {transform_indices = @transform_1, window_bounds = array<i64: 3, 16, 32>}, {transform_indices = @transform_2, window_bounds = array<i64: 3, 16, 32>}, {transform_indices = @transform_3, window_bounds = array<i64: 3, 8, 32>}, {transform_indices = @transform_4, window_bounds = array<i64: 3, 8, 16>}]} {
    %c0 = arith.constant 0 : index
    %c0_0 = arith.constant 0 : index
    %c0_1 = arith.constant 0 : index
    %0 = vector.load %arg1[%c0, %c0_0, %c0_1] : memref<3x8x32xf32, #tpu.memory_space<vmem>>, vector<3x8x32xf32>
    %c0_2 = arith.constant 0 : index
    %c0_3 = arith.constant 0 : index
    %c0_4 = arith.constant 0 : index
    %1 = vector.load %arg2[%c0_2, %c0_3, %c0_4] : memref<3x16x32xf32, #tpu.memory_space<vmem>>, vector<3x16x32xf32>
    %c0_5 = arith.constant 0 : index
    %c0_6 = arith.constant 0 : index
    %c0_7 = arith.constant 0 : index
    %2 = vector.load %arg3[%c0_5, %c0_6, %c0_7] : memref<3x16x32xf32, #tpu.memory_space<vmem>>, vector<3x16x32xf32>
    "tpu.trace_start"() <{level = 10 : i32, message = "bqd,bkd->bqk"}> : () -> ()
    %cst = arith.constant dense<0.000000e+00> : vector<3x8x16xf32>
    %3 = tpu.matmul %0, %1, %cst {dimension_numbers = #tpu.dot_dimension_numbers<[2], [2], [1], [1], [0, 0, 0, 1, 1, 1], [0], [0]>} : vector<3x8x32xf32>, vector<3x16x32xf32>, vector<3x8x16xf32> -> vector<3x8x16xf32>
    "tpu.trace_stop"() : () -> ()
    %cst_8 = arith.constant dense<0xFF800000> : vector<3x8xf32>
    %4 = vector.multi_reduction <maximumf>, %3, %cst_8 [2] : vector<3x8x16xf32> to vector<3x8xf32>
    %5 = vector.shape_cast %4 : vector<3x8xf32> to vector<3x8x1xf32>
    %6 = vector.broadcast %5 : vector<3x8x1xf32> to vector<3x8x16xf32>
    %7 = arith.subf %3, %6 : vector<3x8x16xf32>
    %8 = math.exp %7 : vector<3x8x16xf32>
    %cst_9 = arith.constant dense<0.000000e+00> : vector<3x8xf32>
    %9 = vector.multi_reduction <add>, %8, %cst_9 [2] : vector<3x8x16xf32> to vector<3x8xf32>
    %10 = vector.shape_cast %9 : vector<3x8xf32> to vector<3x8x1xf32>
    %cst_10 = arith.constant 1.000000e+00 : f32
    %11 = vector.broadcast %cst_10 : f32 to vector<3x8x1xf32>
    %12 = arith.divf %11, %10 : vector<3x8x1xf32>
    %13 = vector.broadcast %12 : vector<3x8x1xf32> to vector<3x8x16xf32>
    %14 = arith.mulf %8, %13 : vector<3x8x16xf32>
    "tpu.trace_start"() <{level = 10 : i32, message = "bqk,bkv->bqv"}> : () -> ()
    %cst_11 = arith.constant dense<0.000000e+00> : vector<3x8x32xf32>
    %15 = tpu.matmul %14, %2, %cst_11 {dimension_numbers = #tpu.dot_dimension_numbers<[2], [1], [1], [2], [0, 0, 0, 1, 1, 2], [0], [0]>} : vector<3x8x16xf32>, vector<3x16x32xf32>, vector<3x8x32xf32> -> vector<3x8x32xf32>
    "tpu.trace_stop"() : () -> ()
    %c0_12 = arith.constant 0 : index
    %c0_13 = arith.constant 0 : index
    %c0_14 = arith.constant 0 : index
    %16 = vector.load %arg5[%c0_12, %c0_13, %c0_14] : memref<3x8x16xf32, #tpu.memory_space<vmem>>, vector<3x8x16xf32>
    tpu.vector_store %arg5[%c0_12, %c0_13, %c0_14], %14 {strides = array<i32>} : memref<3x8x16xf32, #tpu.memory_space<vmem>>, vector<3x8x16xf32>,
    %c0_15 = arith.constant 0 : index
    %c0_16 = arith.constant 0 : index
    %c0_17 = arith.constant 0 : index
    %17 = vector.load %arg4[%c0_15, %c0_16, %c0_17] : memref<3x8x32xf32, #tpu.memory_space<vmem>>, vector<3x8x32xf32>
    tpu.vector_store %arg4[%c0_15, %c0_16, %c0_17], %15 {strides = array<i32>} : memref<3x8x32xf32, #tpu.memory_space<vmem>>, vector<3x8x32xf32>,
    return
  }
  func.func @transform_0(%arg0: i32) -> (i32, i32, i32) {
    %c0_i32 = arith.constant 0 : i32
    %c0_i32_0 = arith.constant 0 : i32
    %c0_i32_1 = arith.constant 0 : i32
    return %arg0, %c0_i32, %c0_i32_0 : i32, i32, i32
  }
  func.func @transform_1(%arg0: i32) -> (i32, i32, i32) {
    %c0_i32 = arith.constant 0 : i32
    %c0_i32_0 = arith.constant 0 : i32
    %c0_i32_1 = arith.constant 0 : i32
    return %arg0, %c0_i32, %c0_i32_0 : i32, i32, i32
  }
  func.func @transform_2(%arg0: i32) -> (i32, i32, i32) {
    %c0_i32 = arith.constant 0 : i32
    %c0_i32_0 = arith.constant 0 : i32
    %c0_i32_1 = arith.constant 0 : i32
    return %arg0, %c0_i32, %c0_i32_0 : i32, i32, i32
  }
  func.func @transform_3(%arg0: i32) -> (i32, i32, i32) {
    %c0_i32 = arith.constant 0 : i32
    %c0_i32_0 = arith.constant 0 : i32
    %c0_i32_1 = arith.constant 0 : i32
    return %arg0, %c0_i32, %c0_i32_0 : i32, i32, i32
  }
  func.func @transform_4(%arg0: i32) -> (i32, i32, i32) {
    %c0_i32 = arith.constant 0 : i32
    %c0_i32_0 = arith.constant 0 : i32
    %c0_i32_1 = arith.constant 0 : i32
    return %arg0, %c0_i32, %c0_i32_0 : i32, i32, i32
  }
}

</mosaic_0001>

<bundles_post_ra>
// kernel: tpu_custom_call.1
= control target key start
LH: loop header
LB: loop body
LE: loop exit
PB: predicated region body
PF: predicated region fallthrough
CT: control target
= control target key end

     0   :  { %s1801_s0 = inlined_call_operand.hbm [shape: f32[6,8,32], index: 0, kind: input, shape index: {}]   ;;  %s1802_s1 = inlined_call_operand.hbm [shape: f32[6,16,32], index: 1, kind: input, shape index: {}]   ;;  %s1803_s2 = inlined_call_operand.hbm [shape: f32[6,16,32], index: 2, kind: input, shape index: {}]   ;;  %s1804_s3 = inlined_call_operand.hbm [shape: f32[6,8,32], index: 3, kind: output, shape index: {0}]   ;;  %s1805_s4 = inlined_call_operand.hbm [shape: f32[6,8,16], index: 4, kind: output, shape index: {1}]  }
   0x1   :  { %1814 = sst [smem:[#allocation18_spill]] %s1802_s1 }
   0x2   :  { %10 = vsyncpa [#allocation3], 0 }
   0x3   :  { %12 = vsyncpa [#allocation3 + $0x1], 0 }
   0x4   :  { %13 = vsyncpa [#allocation6], 0 }
   0x5   :  { %15 = vsyncpa [#allocation6 + $0x1], 0 }
   0x6   :  { %16 = vsyncpa [#allocation4], 0 }
   0x7   :  { %18 = vsyncpa [#allocation4 + $0x1], 0 }
   0x8   :  { %19 = vsyncpa [#allocation10], 0 }
   0x9   :  { %21 = vsyncpa [#allocation10 + $0x1], 0  ;;  %s1440_s15 = smov 0   ;;  %s1442_s16 = smov 0  }
   0xa   :  { %s1444_s17 = smov 0   ;;  %s1446_s18 = smov 0  }
   0xb LB: > { %1815 = sst [smem:[#allocation15_spill]] %s1397_s17  ;;  %s1461_s19 = sadd.s32 4294967295, %s1401_s18   ;;  %s1401_s18 = sphi %s1446_s18, %s1834_s18   ;;  %s1397_s17 = sphi %s1444_s17, %s1836_s17   ;;  %s1393_s16 = sphi %s1442_s16, %s1838_s16   ;;  %s1389_s15 = sphi %s1440_s15, %s1837_s15  }
   0xc   : > { %s1009_s20 = sadd.s32 4294967294, %s1401_s18   ;;  %s1465_s21 = sadd.s32 1, %s1401_s18  }
   0xd   : > { %1816 = sst [smem:[#allocation16_spill]] %s1465_s21  ;;  %s34_s22 = sadd.s32 1, %s1397_s17 }
   0xe   : > { %s31_s23 = ssub.s32 %s1401_s18, %s1465_s21  ;;  %p41_p0 = scmp.ne.s32.totalorder %s1397_s17, %s1393_s16 }
   0xf   : > { %p32_p1 = scmp.eq.s32.totalorder %s31_s23, 0  ;;  %p42_p2 = scmp.eq.s32.totalorder %s1401_s18, 0 }
  0x10   : > { %p47_p3 = scmp.ne.s32.totalorder %s1393_s16, %s1389_s15  ;;  %p48_p4 = scmp.eq.s32.totalorder %s1461_s19, 0 }
  0x11   : > { %s1477_s24 = scalar_select %p32_p1, %s1397_s17, %s34_s22  }
  0x12   : > { %p43_p5 = por %p42_p2, %p41_p0  ;;  %p1479_p6 = por %p48_p4, %p47_p3 }
  0x13   : > { %1817 = sst [smem:[#allocation17_spill]] %s1477_s24  ;;  %p123_p7 = scmp.eq.s32.totalorder %s1461_s19, 1 }
  0x14   : > { %s1818_s25 = scalar_select %p1479_p6, 1, 0 }
  0x15   : > { %p129_p8 = scmp.eq.s32.totalorder %s1009_s20, 1  ;;  %p1156_p10 = scmp.lt.s32.totalorder %s1401_s18, 2 }
  0x16   : > { %p1486_p11 = por %p123_p7, %p41_p0  ;;  %s1495_s28 = sand.u32 1, %s1397_s17  }
  0x17   : > { %p1490_p12 = por %p129_p8, %p47_p3  ;;  %p1497_p13 = pnand %p1156_p10, %p43_p5 }
  0x18   : > { %s1819_s26 = scalar_select %p1486_p11, 1, 0 }
  0x19   : > { %s1820_s27 = scalar_select %p1490_p12, 1, 0 }
  0x1a   : > { %s196_s30 = sand.u32 1, %s1401_s18   ;;  %s1808_s5 = smul.u32 48, %s1495_s28 }
  0x1b   : > { %s1041_s6 = smul.u32 768, %s1401_s18  ;;  %p1017_p0 = scmp.ge.s32.totalorder %s1401_s18, 1 }
  0x1c   : > { %p238_p1 = scmp.lt.s32.totalorder %s1401_s18, 3  ;;  %s1822_s1 = sld [smem:[#allocation18_spill]] }
  0x1d   : > { %s200_s10 = scalar_lea.vmem [#allocation5], %s1808_s5  ;;  %s1521_s13 = scalar_lea.sflag [#allocation6], %s196_s30 }
  0x1e   : > { %s208_s11 = sshll.u32 %s200_s10, 4  ;;  %p1517_p2 = pnand %p1017_p0, %p238_p1  ;;  %s1515_s11 = int_to_ptr.vmem [resolvable:$true] %s208_s11 }
  0x1f   : > { %p1527_p4 = pneg %p1497_p13 }
  0x20   : > { %s1823_s12 = scalar_select %p1517_p2, 1, 0 }
  0x22   : > { %s1511_s9 = scalar_lea.hbm %s1822_s1, %s1041_s6  ;;  %s1214_s7 = scalar_lea.hbm %s1822_s1, 1536 }
  0x23   : > { %s1209_s14 = scalar_lea.hbm %s1511_s9, 768  ;;  %p1215_p8 = scmp.lt.u32.totalorder %s1511_s9, %s1822_s1 }
  0x24   : > { %p1210_p3 = scmp.ne.s32.totalorder %s1511_s9, %s1209_s14  ;;  %p1216_p10 = scmp.lt.u32.totalorder %s1214_s7, %s1209_s14 }
  0x25   : > { %p1218_p1 = scmp.lt.u32.totalorder %s1209_s14, %s1511_s9 }
  0x26   : > { %p1212_p5 = pnand %p1527_p4, %p1210_p3  ;;  %p1217_p0 = por %p1216_p10, %p1215_p8 }
  0x28   : > { %p1213_p7 = pneg %p1212_p5  ;;  %p1219_p9 = por %p1218_p1, %p1217_p0 }
  0x2a   : > { %p1220_p12 = pnand %p1219_p9, %p1213_p7 }
  0x2c   : > { %1223 = shalt.err (!%p1220_p12)
}
  0x2d   : > { %s1224_s30 = scalar_lea.vmem %s1515_s11, 768  ;;  %s1403_s22 = smov [#allocation5]  }
  0x2e   : > { %p1225_p3 = scmp.ne.s32.totalorder %s1515_s11, %s1224_s30  ;;  %s1229_s23 = sshll.u32 %s1403_s22, 4  ;;  %s1230_s23 = int_to_ptr.vmem [resolvable:$false] %s1229_s23 }
  0x2f   : > { %s1231_s8 = scalar_lea.vmem %s1230_s23, 1536  ;;  %p1232_p6 = scmp.lt.s32.totalorder %s1515_s11, %s1230_s23 }
  0x30   : > { %p1227_p5 = pnand %p1225_p3, %p1527_p4  ;;  %p1233_p2 = scmp.lt.s32.totalorder %s1231_s8, %s1224_s30 }
  0x32   : > { %p1228_p11 = pneg %p1227_p5  ;;  %p1234_p8 = por %p1233_p2, %p1232_p6 }
  0x34   : > { %p1235_p10 = pnand %p1234_p8, %p1228_p11 }
  0x36   : > { %1238 = shalt.err (!%p1235_p10)
}
  0x37   : > { %s1812_s14 = smov 128   ;;  %s1405_s7 = smov 8  }
  0x38   : > { %1145 = dma.hbm_to_vmem [thread:$0]  (!%p1497_p13), %s1511_s9, 768, %s1515_s11, %s1521_s13, %s1812_s14, %s1812_s14, %s1405_s7  }
  0x39   : > { %s1124_s10 = smul.u32 24, %s1495_s28  ;;  %s1561_s8 = scalar_lea.hbm %s1803_s2, %s1041_s6 }
  0x3a   : > { %s1034_s30 = smul.u32 384, %s1401_s18  ;;  %s176_s6 = scalar_lea.sflag [#allocation3], %s1495_s28 }
  0x3b   : > { %s179_s17 = scalar_lea.vmem [#allocation2], %s1124_s10  ;;  %s1825_s9 = smul.u32 48, %s1495_s28 }
  0x3c   : > { %s1566_s24 = scalar_lea.hbm %s1801_s0, %s1034_s30  ;;  %s186_s21 = sshll.u32 %s179_s17, 4  ;;  %s1568_s21 = int_to_ptr.vmem [resolvable:$true] %s186_s21 }
  0x3d   : > { %s1572_s11 = scalar_lea.vmem [#allocation7], %s1825_s9  ;;  %s1239_s23 = scalar_lea.hbm %s1566_s24, 384 }
  0x3e   : > { %s230_s22 = sshll.u32 %s1572_s11, 4  ;;  %p1240_p6 = scmp.ne.s32.totalorder %s1566_s24, %s1239_s23  ;;  %s1604_s22 = int_to_ptr.vmem [resolvable:$true] %s230_s22 }
  0x3f   : > { %s1244_s30 = scalar_lea.hbm %s1801_s0, 768  ;;  %p1245_p12 = scmp.lt.u32.totalorder %s1566_s24, %s1801_s0 }
  0x40   : > { %p1242_p9 = pnand %p1240_p6, %p1527_p4  ;;  %p1246_p2 = scmp.lt.u32.totalorder %s1244_s30, %s1239_s23 }
  0x41   : > { %p1248_p0 = scmp.lt.u32.totalorder %s1239_s23, %s1566_s24 }
  0x42   : > { %p1243_p11 = pneg %p1242_p9  ;;  %p1247_p7 = por %p1246_p2, %p1245_p12 }
  0x44   : > { %p1249_p1 = por %p1248_p0, %p1247_p7 }
  0x46   : > { %p1250_p3 = pnand %p1249_p1, %p1243_p11 }
  0x48   : > { %1253 = shalt.err (!%p1250_p3)
}
  0x49   : > { %s1254_s17 = scalar_lea.vmem %s1568_s21, 384  ;;  %s1406_s9 = smov [#allocation2]  }
  0x4a   : > { %p1255_p5 = scmp.ne.s32.totalorder %s1568_s21, %s1254_s17  ;;  %s1259_s1 = sshll.u32 %s1406_s9, 4  ;;  %s1260_s1 = int_to_ptr.vmem [resolvable:$false] %s1259_s1 }
  0x4b   : > { %s1261_s14 = scalar_lea.vmem %s1260_s1, 768  ;;  %p1262_p6 = scmp.lt.s32.totalorder %s1568_s21, %s1260_s1 }
  0x4c   : > { %p1257_p8 = pnand %p1255_p5, %p1527_p4  ;;  %p1263_p9 = scmp.lt.s32.totalorder %s1261_s14, %s1254_s17 }
  0x4e   : > { %p1258_p10 = pneg %p1257_p8  ;;  %p1264_p12 = por %p1263_p9, %p1262_p6 }
  0x50   : > { %p1265_p2 = pnand %p1264_p12, %p1258_p10 }
  0x52   : > { %1268 = shalt.err (!%p1265_p2)
}
  0x53   : > { %s1826_s23 = smov 128   ;;  %s1269_s5 = scalar_lea.hbm %s1561_s8, 768 }
  0x54   : > { %1142 = dma.hbm_to_vmem [thread:$0]  (!%p1497_p13), %s1566_s24, 384, %s1568_s21, %s176_s6, %s1826_s23, %s1826_s23, %s1405_s7  }
  0x55   : > { %p1270_p11 = scmp.ne.s32.totalorder %s1561_s8, %s1269_s5  ;;  %s1274_s28 = scalar_lea.hbm %s1803_s2, 1536 }
  0x56   : > { %p1275_p1 = scmp.lt.u32.totalorder %s1561_s8, %s1803_s2  ;;  %p1276_p3 = scmp.lt.u32.totalorder %s1274_s28, %s1269_s5 }
  0x57   : > { %p1272_p7 = pnand %p1270_p11, %p1527_p4  ;;  %p1278_p8 = scmp.lt.u32.totalorder %s1269_s5, %s1561_s8 }
  0x58   : > { %p1277_p5 = por %p1276_p3, %p1275_p1 }
  0x59   : > { %p1273_p0 = pneg %p1272_p7 }
  0x5a   : > { %p1279_p10 = por %p1278_p8, %p1277_p5 }
  0x5c   : > { %p1280_p6 = pnand %p1279_p10, %p1273_p0 }
  0x5e   : > { %1283 = shalt.err (!%p1280_p6)
}
  0x5f   : > { %s1284_s21 = scalar_lea.vmem %s1604_s22, 768  ;;  %s1407_s24 = smov [#allocation7]  }
  0x60   : > { %p1285_p9 = scmp.ne.s32.totalorder %s1604_s22, %s1284_s21  ;;  %s1289_s11 = sshll.u32 %s1407_s24, 4  ;;  %s1290_s11 = int_to_ptr.vmem [resolvable:$false] %s1289_s11 }
  0x61   : > { %s1291_s6 = scalar_lea.vmem %s1290_s11, 1536  ;;  %p1292_p11 = scmp.lt.s32.totalorder %s1604_s22, %s1290_s11 }
  0x62   : > { %p1287_p12 = pnand %p1285_p9, %p1527_p4  ;;  %p1293_p7 = scmp.lt.s32.totalorder %s1291_s6, %s1284_s21 }
  0x64   : > { %p1288_p2 = pneg %p1287_p12  ;;  %p1294_p1 = por %p1293_p7, %p1292_p11 }
  0x66   : > { %p1295_p3 = pnand %p1294_p1, %p1288_p2 }
  0x68   : > { %1298 = shalt.err (!%p1295_p3)
}
  0x69   : > { %1148 = dma.hbm_to_vmem [thread:$0]  (!%p1497_p13), %s1561_s8, 768, %s1604_s22, %s1521_s13, %s1826_s23, %s1826_s23, %s1405_s7  }
  0x6a   : > { %p1827_p4 = scmp.ne.s32.totalorder %s1823_s12, 0 }
  0x6b   : > { %s1634_s20 = sand.u32 (!%p1827_p4), 1, %s1393_s16   ;;  %p1828_p0 = scmp.ne.s32.totalorder (!%p1827_p4), %s1818_s25, 0 }
  0x6c   : > { %242 = sbr.rel (%p1827_p4) target bundleno = 891 (0x37b), region = 32  ;;  %s245_s29 = scalar_lea.sflag (!%p1827_p4), [#allocation3], %s1634_s20 }
  0x6d   : > { %s1637_s1 = smul.u32 (!%p1827_p4), 24, %s1634_s20 }
  0x6f   : > { %s1641_s14 = scalar_lea.vmem (!%p1827_p4), [#allocation2], %s1637_s1 }
  0x73   : > { %1372 = dma.done.wait (%p1828_p0), %s245_s29, 384  }
  0x74   : > { %1374 = vsyncadd (%p1828_p0), %s245_s29, 4294966912  ;;  %s253_s12 = sand.u32 1, %s1461_s19   ;;  %s1128_s13 = smul.u32 48, %s1634_s20 }
  0x75   : > { %s254_s7 = scalar_lea.sflag [#allocation6], %s253_s12 }
  0x76   : > { %s257_s8 = scalar_lea.vmem [#allocation5], %s1128_s13 }
  0x77   : > { %1376 = dma.done.wait (%p1828_p0), %s254_s7, 1536  }
  0x78   : > { %1378 = vsyncadd (%p1828_p0), %s254_s7, 4294965760  ;;  %v1408_v0 = vmov 0.0|0.0   ;;  %vm1409_vm0 = vmmov 0   ;;  %v1410_v1 = vmov 0.0   ;;  %vm326_vm1 = vcmask 261120   ;;  %v314_v3 = vld [vmem:[%s257_s8] sm:$0xff] }
  0x79   : > { %1103 = vmatprep.subr.bf16.mxu0 %v1408_v0  ;;  %1107 = vmatprep.subr.bf16.mxu1 %v1408_v0  ;;  %vm1663_vm2 = vmpackc.low %vm326_vm1, %vm326_vm1  ;;  %v315_v4 = vld [vmem:[%s257_s8 + $0x8] sm:$0xff]  ;;  %v316_v5 = vld [vmem:[%s257_s8 + $0x10] sm:$0xff]  ;;  %vm564_vm3 = vcmask 130048   ;;  %s266_s25 = scalar_lea.vmem [#allocation7], %s1128_s13  ;;  %s305_s22 = scalar_lea.vmem [#allocation9], %s1637_s1 }
  0x7a   : > { %1065 = vmatprep.mubr.msk.f32.mxu0 %vm1409_vm0, %v1410_v1  ;;  %1072 = vmatprep.mubr.msk.f32.mxu1 %vm1409_vm0, %v1410_v1  ;;  %v1104_v6 = vpack.c.bf16 %v315_v4, %v314_v3  ;;  %v317_v7 = vld [vmem:[%s257_s8 + $0x18] sm:$0xff]  ;;  %v318_v9 = vld [vmem:[%s257_s8 + $0x20] sm:$0xff]  ;;  %v319_v10 = vld [vmem:[%s257_s8 + $0x28] sm:$0xff]  ;;  %s1039_s23 = smul.u32 384, %s1461_s19  ;;  %s861_s5 = sshll.u32 %s305_s22, 4  ;;  %s1714_s5 = int_to_ptr.vmem [resolvable:$true] %s861_s5 }
  0x7b   : > { %v1108_v8 = vpack.c.bf16 %v317_v7, %v316_v5  ;;  %v311_v11 = vld [vmem:[%s1641_s14] sm:$0xff]  ;;  %v1112_v12 = vpack.c.bf16 %v319_v10, %v318_v9  ;;  %v312_v13 = vld [vmem:[%s1641_s14 + $0x8] sm:$0xff]  ;;  %v313_v14 = vld [vmem:[%s1641_s14 + $0x10] sm:$0xff]  ;;  %s832_s17 = scalar_lea.sflag [#allocation10], %s1634_s20  ;;  %s1299_s9 = scalar_lea.vmem %s1714_s5, 384 }
  0x7c   : > { %1106 = vmatpush3.bf16.xpose.msk.msra.mxu0 %vm1663_vm2, %v1104_v6  ;;  %v320_v39 = vld [vmem:[%s266_s25] sm:$0xff]  ;;  %v321_v40 = vld [vmem:[%s266_s25 + $0x8] sm:$0xff]  ;;  %v322_v48 = vld [vmem:[%s266_s25 + $0x10] sm:$0xff]  ;;  %s1712_s28 = scalar_lea.hbm %s1805_s4, %s1039_s23  ;;  %p1300_p13 = scmp.ne.s32.totalorder %s1714_s5, %s1299_s9 }
  0x7d   : > { %1110 = vmatpush3.bf16.xpose.msk.msra.mxu1 %vm1663_vm2, %v1108_v8  ;;  %1111 = vmatprep.subr.bf16.mxu0 %v1408_v0  ;;  %v1116_v41 = vpack.c.bf16 %v321_v40, %v320_v39  ;;  %v324_v42 = vld [vmem:[%s266_s25 + $0x20] sm:$0xff]  ;;  %v325_v43 = vld [vmem:[%s266_s25 + $0x28] sm:$0xff]  ;;  %v323_v49 = vld [vmem:[%s266_s25 + $0x18] sm:$0xff]  ;;  %p1831_p5 = scmp.ne.s32.totalorder %s1819_s26, 0  ;;  %s1411_s21 = smov [#allocation9]  }
  0x7e   : > { %1115 = vmatprep.subr.bf16.mxu1 %v1408_v0  ;;  %v1122_v44 = vpack.c.bf16 %v325_v43, %v324_v42  ;;  %v1119_v51 = vpack.c.bf16 %v323_v49, %v322_v48  ;;  %s1303_s24 = sshll.u32 %s1411_s21, 4  ;;  %s1304_s24 = int_to_ptr.vmem [resolvable:$false] %s1303_s24 }
  0x7f   : > { %p1301_p8 = pnand %p1300_p13, %p1831_p5  ;;  %s1305_s11 = scalar_lea.vmem %s1304_s24, 768 }
  0x80   : > { %p1306_p6 = scmp.lt.s32.totalorder %s1714_s5, %s1304_s24  ;;  %p1307_p9 = scmp.lt.s32.totalorder %s1305_s11, %s1299_s9 }
  0x81   : > { %p1302_p10 = pneg %p1301_p8 }
  0x82   : > { %p1308_p12 = por %p1307_p9, %p1306_p6 }
  0x83   : > { %1066 = vmatmul.mubr.msk.f32.vlgmr.msra.gmra.mrb[0].mxu0 %vm326_vm1, %v311_v11 }
  0x84   : > { %1114 = vmatpush3.bf16.xpose.msk.msra.mxu0 %vm1663_vm2, %v1112_v12  ;;  %1073 = vmatmul.mubr.msk.f32.vlgmr.msra.gmra.mrb[0].mxu1 %vm326_vm1, %v312_v13  ;;  %p1309_p2 = pnand %p1308_p12, %p1302_p10 }
  0x85   : > { %1079 = vmatprep.mubr.msk.f32.mxu0 %vm1409_vm0, %v1410_v1  ;;  %1086 = vmatprep.mubr.msk.f32.mxu1 %vm1409_vm0, %v1410_v1 }
  0x86   : > { %1121 = vmatprep.subr.bf16.mxu0 %v1408_v0  ;;  %1117 = vmatpush3.bf16.msra.mxu1 %v1116_v41 }
  0x87   : > { %1118 = vmatprep.subr.bf16.mxu1 %v1408_v0 }
  0x8b   : > { %1080 = vmatmul.mubr.msk.f32.vlgmr.msra.gmra.mrb[2].mxu0 %vm326_vm1, %v313_v14 }
  0x8c   : > { %1100 = vmatprep.mubr.msk.f32.mxu0 %vm1409_vm0, %v1410_v1  ;;  %1123 = vmatpush3.bf16.msra.mxu0 %v1122_v44 }
 0x156   : > { %v402_v15 = vpop.f32.mrb[0].mxu0 }
 0x157   : > { %v1067_v16 = vpop.f32.mrb[1].mxu0  ;;  %v565_v17 = vsel %vm564_vm3, %v402_v15, -inf  ;;  %v481_v18 = vpop.f32.mrb[0].mxu1 }
 0x158   : > { %566 = vmax.xlane.f32.xlu0 %v565_v17  ;;  %v1074_v19 = vpop.f32.mrb[1].mxu1  ;;  %v568_v20 = vsel %vm564_vm3, %v481_v18, -inf }
 0x15c   : > { %569 = vmax.xlane.f32.xlu0 %v568_v20 }
 0x15e   : > { %v560_v21 = vpop.f32.mrb[2].mxu0 }
 0x15f   : > { %v1081_v22 = vpop.f32.mrb[3].mxu0  ;;  %v571_v23 = vsel %vm564_vm3, %v560_v21, -inf }
 0x160   : > { %572 = vmax.xlane.f32.xlu1 %v571_v23 }
 0x1e5   : > { %v567_v24 = vpop.xlane.xlu0 %566 }
 0x1e6   : > { %v574_v25 = vsub.f32 %v402_v15, %v567_v24 }
 0x1e8   : > { %v577_v26 = vmul.f32 1.442695, %v574_v25 }
 0x1e9   : > { %v570_v27 = vpop.xlane.xlu0 %569 }
 0x1ea   : > { %1197 = vpow2.f32 %v577_v26  ;;  %v575_v28 = vsub.f32 %v481_v18, %v570_v27 }
 0x1ec   : > { %v579_v29 = vmul.f32 1.442695, %v575_v28 }
 0x1ed   : > { %v573_v30 = vpop.xlane.xlu1 %572 }
 0x1ee   : > { %1199 = vpow2.f32 %v579_v29  ;;  %v576_v31 = vsub.f32 %v560_v21, %v573_v30 }
 0x1f0   : > { %v581_v32 = vmul.f32 1.442695, %v576_v31 }
 0x1f2   : > { %1201 = vpow2.f32 %v581_v32 }
 0x1f4   : > { %v1198_v33 = vpop.eup %1197 }
 0x1f5   : > { %v583_v34 = vsel %vm564_vm3, %v1198_v33, 0.0 }
 0x1f6   : > { %584 = vadd.xlane.f32.xlu1 %v583_v34 }
 0x1f8   : > { %v1200_v35 = vpop.eup %1199 }
 0x1f9   : > { %v586_v36 = vsel %vm564_vm3, %v1200_v35, 0.0 }
 0x1fa   : > { %587 = vadd.xlane.f32.xlu0 %v586_v36 }
 0x1fc   : > { %v1202_v37 = vpop.eup %1201 }
 0x1fd   : > { %v589_v38 = vsel %vm564_vm3, %v1202_v37, 0.0 }
 0x1fe   : > { %590 = vadd.xlane.f32.xlu1 %v589_v38 }
 0x283   : > { %v585_v45 = vpop.xlane.xlu1 %584 }
 0x284   : > { %1203 = vrcp.f32 %v585_v45 }
 0x287   : > { %v588_v46 = vpop.xlane.xlu0 %587 }
 0x288   : > { %1205 = vrcp.f32 %v588_v46 }
 0x28b   : > { %v591_v47 = vpop.xlane.xlu1 %590 }
 0x28c   : > { %1207 = vrcp.f32 %v591_v47 }
 0x28e   : > { %v1204_v50 = vpop.eup %1203 }
 0x28f   : > { %v598_v52 = vmul.f32 %v1204_v50, %v1198_v33 }
 0x291   : > { %820 = vst.msk [vmem:[%s305_s22] sm:$0xff] %vm564_vm3, %v598_v52  ;;  %1087 = vmatmul.mubr.msk.f32.vlgmr.msra.gmra.mrb[2].mxu1 %vm564_vm3, %v598_v52 }
 0x292   : > { %v1206_v53 = vpop.eup %1205  ;;  %1120 = vmatpush3.bf16.msra.mxu1 %v1119_v51  ;;  %1093 = vmatprep.mubr.msk.f32.mxu1 %vm1409_vm0, %v1410_v1 }
 0x293   : > { %v599_v54 = vmul.f32 %v1206_v53, %v1200_v35 }
 0x295   : > { %821 = vst.msk [vmem:[%s305_s22 + $0x8] sm:$0xff] %vm564_vm3, %v599_v54  ;;  %1094 = vmatmul.mubr.msk.f32.vlgmr.msra.gmra.mrb[4].mxu1 %vm564_vm3, %v599_v54 }
 0x296   : > { %v1208_v55 = vpop.eup %1207 }
 0x297   : > { %v600_v56 = vmul.f32 %v1208_v55, %v1202_v37 }
 0x299   : > { %822 = vst.msk [vmem:[%s305_s22 + $0x10] sm:$0xff] %vm564_vm3, %v600_v56  ;;  %1101 = vmatmul.mubr.msk.f32.vlgmr.msra.gmra.mrb[4].mxu0 %vm564_vm3, %v600_v56 }
 0x29a   : > { %1312 = shalt.err (!%p1309_p2)
}
 0x29b   : > { %s1313_s6 = scalar_lea.hbm %s1712_s28, 384  ;;  %s1317_s12 = scalar_lea.hbm %s1805_s4, 768 }
 0x29c   : > { %p1314_p11 = scmp.ne.s32.totalorder %s1712_s28, %s1313_s6  ;;  %p1318_p3 = scmp.lt.u32.totalorder %s1712_s28, %s1805_s4 }
 0x29d   : > { %p1319_p4 = scmp.lt.u32.totalorder %s1317_s12, %s1313_s6  ;;  %p1321_p13 = scmp.lt.u32.totalorder %s1313_s6, %s1712_s28 }
 0x29e   : > { %p1315_p7 = pnand %p1314_p11, %p1831_p5 }
 0x29f   : > { %p1320_p0 = por %p1319_p4, %p1318_p3 }
 0x2a0   : > { %p1316_p1 = pneg %p1315_p7 }
 0x2a1   : > { %p1322_p8 = por %p1321_p13, %p1320_p0 }
 0x2a3   : > { %p1323_p10 = pnand %p1322_p8, %p1316_p1 }
 0x2a5   : > { %1326 = shalt.err (!%p1323_p10)
}
 0x2a6   : > { %s1412_s8 = smov 128   ;;  %s1413_s25 = smov 8  }
 0x2a7   : > { %1136 = dma.vmem_to_hbm [thread:$0]  (%p1831_p5), %s1714_s5, 384, %s1712_s28, %s832_s17, %s1412_s8, %s1412_s8, %s1413_s25  }
 0x2a8   : > { %s298_s22 = scalar_lea.vmem [#allocation8], %s1637_s1  ;;  %s1753_s5 = scalar_lea.hbm %s1804_s3, %s1039_s23 }
 0x2a9   : > { %s845_s30 = sshll.u32 %s298_s22, 4  ;;  %s827_s1 = scalar_lea.sflag [#allocation4], %s1634_s20  ;;  %s1746_s30 = int_to_ptr.vmem [resolvable:$true] %s845_s30 }
 0x2aa   : > { %s1327_s28 = scalar_lea.vmem %s1746_s30, 384  ;;  %s1414_s17 = smov [#allocation8]  }
 0x2ab   : > { %p1328_p6 = scmp.ne.s32.totalorder %s1746_s30, %s1327_s28  ;;  %s1331_s19 = sshll.u32 %s1414_s17, 4  ;;  %s1332_s19 = int_to_ptr.vmem [resolvable:$false] %s1331_s19 }
 0x2ac   : > { %s1333_s21 = scalar_lea.vmem %s1332_s19, 768  ;;  %p1334_p2 = scmp.lt.s32.totalorder %s1746_s30, %s1332_s19 }
 0x2ad   : > { %p1329_p9 = pnand %p1328_p6, %p1831_p5  ;;  %p1335_p11 = scmp.lt.s32.totalorder %s1333_s21, %s1327_s28 }
 0x2af   : > { %p1330_p12 = pneg %p1329_p9  ;;  %p1336_p7 = por %p1335_p11, %p1334_p2 }
 0x2b1   : > { %p1337_p1 = pnand %p1336_p7, %p1330_p12 }
 0x364   : > { %v670_v57 = vpop.f32.mrb[2].mxu1 }
 0x365   : > { %823 = vst.msk [vmem:[%s298_s22] sm:$0xff] %vm326_vm1, %v670_v57  ;;  %v1088_v58 = vpop.f32.mrb[3].mxu1 }
 0x368   : > { %v743_v59 = vpop.f32.mrb[4].mxu1 }
 0x369   : > { %824 = vst.msk [vmem:[%s298_s22 + $0x8] sm:$0xff] %vm326_vm1, %v743_v59  ;;  %v1095_v60 = vpop.f32.mrb[5].mxu1 }
 0x36c   : > { %v816_v61 = vpop.f32.mrb[4].mxu0 }
 0x36d   : > { %825 = vst.msk [vmem:[%s298_s22 + $0x10] sm:$0xff] %vm326_vm1, %v816_v61  ;;  %v1102_v62 = vpop.f32.mrb[5].mxu0 }
 0x36e   : > { %1340 = shalt.err (!%p1337_p1)
}
 0x36f   : > { %s1341_s23 = scalar_lea.hbm %s1753_s5, 384  ;;  %s1345_s6 = scalar_lea.hbm %s1804_s3, 768 }
 0x370   : > { %p1342_p3 = scmp.ne.s32.totalorder %s1753_s5, %s1341_s23  ;;  %p1346_p13 = scmp.lt.u32.totalorder %s1753_s5, %s1804_s3 }
 0x371   : > { %p1347_p8 = scmp.lt.u32.totalorder %s1345_s6, %s1341_s23  ;;  %p1349_p6 = scmp.lt.u32.totalorder %s1341_s23, %s1753_s5 }
 0x372   : > { %p1343_p4 = pnand %p1342_p3, %p1831_p5 }
 0x373   : > { %p1348_p10 = por %p1347_p8, %p1346_p13 }
 0x374   : > { %p1344_p0 = pneg %p1343_p4 }
 0x375   : > { %p1350_p9 = por %p1349_p6, %p1348_p10 }
 0x377   : > { %p1351_p12 = pnand %p1350_p9, %p1344_p0 }
 0x379   : > { %1354 = shalt.err (!%p1351_p12)
}
 0x37a   : > { %1135 = dma.vmem_to_hbm [thread:$0]  (%p1831_p5), %s1746_s30, 384, %s1753_s5, %s827_s1, %s1412_s8, %s1412_s8, %s1413_s25  }
 0x37b PF: > { %s876_s12 = sand.u32 1, %s1389_s15   ;;  %p1832_p2 = scmp.ne.s32.totalorder %s1820_s27, 0 }
 0x37c   : > { %p1833_p11 = scmp.ge.s32.totalorder %s1401_s18, 2  ;;  %s877_s13 = scalar_lea.sflag [#allocation4], %s876_s12 }
 0x37e   : > { %p1150_p7 = pnand %p1833_p11, %p1832_p2 }
 0x380   : > { %1380 = dma.done.wait (!%p1150_p7), %s877_s13, 384  }
 0x381   : > { %1382 = vsyncadd (!%p1150_p7), %s877_s13, 4294966912  ;;  %s886_s26 = scalar_lea.sflag [#allocation10], %s876_s12 }
 0x382   : > { %1384 = dma.done.wait (!%p1150_p7), %s886_s26, 384  }
 0x383   : > { %1386 = vsyncadd (!%p1150_p7), %s886_s26, 4294966912  ;;  %s1834_s18 = sld [smem:[#allocation16_spill]]  ;;  %s1835_s20 = sld [smem:[#allocation15_spill]] }
 0x384   : > { %s1836_s17 = sld [smem:[#allocation17_spill]]  ;;  %s1837_s15 = smov %s1393_s16 }
 0x389   : > { %p24_p5 = scmp.ge.s32.totalorder %s1834_s18, 4   ;;  %s1838_s16 = smov %s1835_s20 }
 0x38b   :  { %26 = sbr.rel (!%p24_p5) target bundleno = 11 (0xb), region = 118 }
 0x392   :  { %891 = vsyncpa [#allocation3], 1 }
 0x393   :  { %893 = vsyncpa [#allocation3 + $0x1], 1 }
 0x394   :  { %894 = vsyncpa [#allocation6], 1 }
 0x395   :  { %896 = vsyncpa [#allocation6 + $0x1], 1 }
 0x396   :  { %897 = vsyncpa [#allocation4], 1 }
 0x397   :  { %899 = vsyncpa [#allocation4 + $0x1], 1 }
 0x398   :  { %900 = vsyncpa [#allocation10], 1 }
 0x399   :  { %902 = vsyncpa [#allocation10 + $0x1], 1 }

</bundles_post_ra>
